<compile_context>
chip_gen: v7x
topology: tpu7x:2x2x1
jax: 0.10.0
libtpu: 0.0.40
codegen_flags: <defaults>
</compile_context>

<pallas_src>
import functools

import numpy as np
import jax
import jax.numpy as jnp
from jax import lax
from jax.experimental import pallas as pl
from jax.experimental.pallas import tpu as pltpu

C = 32       # channels of x.F
G = 8        # GroupNorm num_groups
EPS = 1e-5   # GroupNorm eps (PyTorch default)

_TN_MAX = 8192   # point-tile rows (multiple of 128; 1 MiB of f32 features per tile)


def _round_up(x, m):
    return ((x + m - 1) // m) * m


def _vmem_limit_bytes():
    # Review item 3: never request v7x's whole 64 MiB of physical VMEM per TC.
    try:
        cap = int(pltpu.get_tpu_info().vmem_capacity_bytes)
        return int(min(48 * 2**20, (3 * cap) // 4))
    except Exception:
        return 48 * 2**20


def _stats_kernel(x_ref, dec_ref, sums_ref, sumsq_ref, *, n_rows, tile_rows, b_pad):
    """Phase 1: accumulate per-(decomposition, channel) sum and sum-of-squares.

    x_ref     : (TN, C)    f32 feature rows (points on sublanes, channels on lanes)
    dec_ref   : (1, TN)    i32 decomposition id per point (-1 = none)
    sums_ref  : (B_pad, C) f32 accumulator, resident across the "arbitrary" grid axis
    sumsq_ref : (B_pad, C) f32 accumulator
    """
    i = pl.program_id(0)

    @pl.when(i == 0)
    def _init():
        sums_ref[...] = jnp.zeros_like(sums_ref)
        sumsq_ref[...] = jnp.zeros_like(sumsq_ref)

    x = x_ref[...].astype(jnp.float32)                                   # (TN, C)
    dec = dec_ref[...]                                                   # (1, TN)

    # The last tile may run past the array end: zero those rows so stale / garbage
    # VMEM contents (possibly inf/nan) cannot poison the MXU accumulation.
    row = lax.broadcasted_iota(jnp.int32, (tile_rows, 1), 0) + i * tile_rows
    x = jnp.where(row < n_rows, x, 0.0)

    # One-hot membership (B_pad, TN); dec == -1 matches no column, zeroed rows add 0.
    onehot = (lax.broadcasted_iota(jnp.int32, (b_pad, tile_rows), 0) == dec)
    onehot = onehot.astype(jnp.float32)

    sums_ref[...] += jnp.dot(onehot, x, preferred_element_type=jnp.float32)
    sumsq_ref[...] += jnp.dot(onehot, x * x, preferred_element_type=jnp.float32)


def _normalize_kernel(x_ref, dec_ref, scale_ref, bias_ref, o_ref, *, tile_rows, b_pad):
    """Phase 2: y = x * scale[dec, :] + bias[dec, :] (single FMA-style pass).

    x_ref     : (TN, C)    features
    dec_ref   : (TN, 1)    i32 decomposition id per point (-1 = none)
    scale_ref : (B_pad, C) folded per-decomposition scale (rsqrt(var+eps) * gamma)
    bias_ref  : (B_pad, C) folded per-decomposition bias  (beta - mean * scale)
    o_ref     : (TN, C)    output, original row order
    """
    x = x_ref[...].astype(jnp.float32)                                   # (TN, C)
    dec = dec_ref[...]                                                   # (TN, 1)
    onehot = (lax.broadcasted_iota(jnp.int32, (tile_rows, b_pad), 1) == dec)
    onehot = onehot.astype(jnp.float32)                                  # (TN, B_pad)
    scale = jnp.dot(onehot, scale_ref[...], preferred_element_type=jnp.float32)
    bias = jnp.dot(onehot, bias_ref[...], preferred_element_type=jnp.float32)
    # Points outside every decomposition get scale = bias = 0 -> output 0 (matches
    # the previous kernel); rows past the array end are write-masked by Pallas.
    o_ref[...] = (x * scale + bias).astype(o_ref.dtype)


def batched_minkowski_groupnorm(feats, perms, gamma, beta, *,
                                num_groups=G, eps=EPS, tile_rows=None):
    """BatchedMinkowski(GroupNorm) applied to x.F.

    feats : (N, C) float32 — sparse tensor features x.F (original row order)
    perms : list of 1-D int index arrays — x.decomposition_permutations
    Returns the (N, C) features that set_feature would re-attach, original order.
    """
    n, cn = feats.shape
    assert cn % num_groups == 0, "channels must be divisible by num_groups"
    cpg = cn // num_groups

    if n == 0:
        return feats
    num_dec = len(perms)
    if num_dec == 0:
        # Correctness review: empty decomposition list with live points is undefined.
        raise ValueError("BatchedMinkowski: x has points but no batch decompositions.")

    lens = [int(p.shape[0]) for p in perms]
    perm_np = (np.concatenate([np.asarray(p, dtype=np.int64).reshape(-1) for p in perms])
               if sum(lens) else np.zeros((0,), np.int64))
    if perm_np.size:
        if (perm_np.min() < 0 or perm_np.max() >= n
                or np.unique(perm_np).size != perm_np.size):
            raise ValueError("decomposition permutations must be disjoint indices in [0, N)")

    b_pad = _round_up(num_dec, 8)            # sublane-aligned one-hot / table height

    # Per-point decomposition id in the ORIGINAL row order (-1 -> not in any decomposition).
    dec_np = np.full((n,), -1, dtype=np.int32)
    off = 0
    for b, l in enumerate(lens):
        dec_np[perm_np[off:off + l]] = b
        off += l
    dec = jnp.asarray(dec_np)
    dec_row = dec[None, :]                   # (1, N)  points on lanes    (phase 1)
    dec_col = dec[:, None]                   # (N, 1)  points on sublanes (phase 2)

    # Tile the point axis: one full-array block when it fits, 8192-row tiles otherwise.
    if tile_rows is None:
        tn = n if n <= _TN_MAX else _TN_MAX
    else:
        tn = min(int(tile_rows), n)
    if tn < n and tn % 128 != 0:
        raise ValueError("tile_rows must be a multiple of 128 when it does not cover all rows")
    num_tiles = -(-n // tn)
    vmem_limit = _vmem_limit_bytes()

    # ---------- phase 1: per-(decomposition, channel) sum / sum-of-squares ----------
    stats_fn = functools.partial(_stats_kernel, n_rows=n, tile_rows=tn, b_pad=b_pad)
    sums, sumsq = pl.pallas_call(
        stats_fn,
        out_shape=(jax.ShapeDtypeStruct((b_pad, cn), jnp.float32),
                   jax.ShapeDtypeStruct((b_pad, cn), jnp.float32)),
        grid=(num_tiles,),
        in_specs=[pl.BlockSpec((tn, cn), lambda i: (i, 0)),
                  pl.BlockSpec((1, tn), lambda i: (0, i))],
        out_specs=(pl.BlockSpec((b_pad, cn), lambda i: (0, 0)),
                   pl.BlockSpec((b_pad, cn), lambda i: (0, 0))),
        compiler_params=pltpu.CompilerParams(
            dimension_semantics=("arbitrary",),   # reduction into resident accumulators
            vmem_limit_bytes=vmem_limit),
    )(feats, dec_row)

    # ---------- tiny folded (B_pad, C) scale / bias tables (plain XLA, ~B*C floats) ----------
    counts = np.zeros((b_pad,), np.float32)
    counts[:num_dec] = np.asarray(lens, np.float32)
    cnt_g = jnp.asarray(np.maximum(counts * cpg, 1.0))[:, None]          # (B_pad, 1), static
    sums_g = jnp.sum(sums.reshape(b_pad, num_groups, cpg), axis=-1)      # (B_pad, G)
    sumsq_g = jnp.sum(sumsq.reshape(b_pad, num_groups, cpg), axis=-1)    # (B_pad, G)
    mean_g = sums_g / cnt_g
    var_g = jnp.maximum(sumsq_g / cnt_g - mean_g * mean_g, 0.0)          # f32 acc, clamp >= 0
    inv_g = lax.rsqrt(var_g + jnp.float32(eps))
    mean_c = jnp.repeat(mean_g, cpg, axis=1)                             # (B_pad, C)
    inv_c = jnp.repeat(inv_g, cpg, axis=1)                               # (B_pad, C)
    gamma_r = gamma.reshape(1, cn).astype(jnp.float32)
    beta_r = beta.reshape(1, cn).astype(jnp.float32)
    scale_t = inv_c * gamma_r                                            # (B_pad, C)
    bias_t = beta_r - mean_c * scale_t                                   # (B_pad, C)

    # ---------- phase 2: y = x * scale[dec] + bias[dec] ----------
    norm_fn = functools.partial(_normalize_kernel, tile_rows=tn, b_pad=b_pad)
    out = pl.pallas_call(
        norm_fn,
        out_shape=jax.ShapeDtypeStruct((n, cn), feats.dtype),
        grid=(num_tiles,),
        in_specs=[pl.BlockSpec((tn, cn), lambda i: (i, 0)),
                  pl.BlockSpec((tn, 1), lambda i: (i, 0)),
                  pl.BlockSpec((b_pad, cn), lambda i: (0, 0)),
                  pl.BlockSpec((b_pad, cn), lambda i: (0, 0))],
        out_specs=pl.BlockSpec((tn, cn), lambda i: (i, 0)),
        compiler_params=pltpu.CompilerParams(
            dimension_semantics=("parallel",),    # disjoint output tiles; v7x megacore shards
            vmem_limit_bytes=vmem_limit),
    )(feats, dec_col, scale_t, bias_t)

    # TODO(synk): MinkowskiEngine's coordinate-map / coordinate-manager re-attachment
    # (set_feature bookkeeping) has no array equivalent; only the features are returned.
    return out


def _reference_forward(feats, perms, gamma, beta, *, num_groups=G, eps=EPS):
    """Pure-JAX reference: gather per decomposition, GroupNorm, inverse-perm scatter."""
    cn = feats.shape[1]
    cpg = cn // num_groups
    outs = []
    for p in perms:
        x = feats[p].T[None]                                   # (1, C, n_b)
        nb = x.shape[-1]
        xg = x.reshape(1, num_groups, cpg, nb)
        mean = xg.mean(axis=(2, 3), keepdims=True)
        var = ((xg - mean) ** 2).mean(axis=(2, 3), keepdims=True)
        y = (xg - mean) / jnp.sqrt(var + eps)
        y = y.reshape(1, cn, nb)
        y = y * gamma[None, :, None] + beta[None, :, None]
        outs.append(y[0].T)
    ft = jnp.concatenate(outs, axis=0)
    perm = jnp.concatenate([p.astype(jnp.int32) for p in perms], axis=0)
    inv = jnp.zeros_like(perm).at[perm].set(jnp.arange(perm.shape[0], dtype=perm.dtype))
    return ft[inv]


if __name__ == "__main__":
    key = jax.random.PRNGKey(0)
    k_f, k_g, k_b, k_p, k_f2, k_p2 = jax.random.split(key, 6)

    gamma = 1.0 + 0.1 * jax.random.normal(k_g, (C,), dtype=jnp.float32)  # GroupNorm weight
    beta = 0.1 * jax.random.normal(k_b, (C,), dtype=jnp.float32)         # GroupNorm bias

    # --- test A: small single-block path (odd N, includes an empty decomposition) ---
    lengths_a = [100, 90, 0]
    n_a = sum(lengths_a)
    feats_a = jax.random.normal(k_f, (n_a, C), dtype=jnp.float32)        # x.F
    full_perm_a = jax.random.permutation(k_p, n_a).astype(jnp.int32)
    perms_a, off = [], 0
    for l in lengths_a:
        perms_a.append(full_perm_a[off:off + l])
        off += l

    out_a = jax.block_until_ready(batched_minkowski_groupnorm(feats_a, perms_a, gamma, beta))
    ref_a = _reference_forward(feats_a, perms_a, gamma, beta)
    assert out_a.shape == (n_a, C) and out_a.dtype == jnp.float32
    assert jnp.allclose(out_a, ref_a, atol=1e-4, rtol=1e-4), "mismatch vs reference (A)"

    # --- test B: multi-tile two-phase path (4 point tiles, nonzero-mean features) ---
    lengths_b = [200, 180, 132]
    n_b = sum(lengths_b)                                                  # 512 = 4 * 128
    feats_b = 3.0 + jax.random.normal(k_f2, (n_b, C), dtype=jnp.float32)
    full_perm_b = jax.random.permutation(k_p2, n_b).astype(jnp.int32)
    perms_b, off = [], 0
    for l in lengths_b:
        perms_b.append(full_perm_b[off:off + l])
        off += l

    out_b = jax.block_until_ready(
        batched_minkowski_groupnorm(feats_b, perms_b, gamma, beta, tile_rows=128))
    ref_b = _reference_forward(feats_b, perms_b, gamma, beta)
    assert out_b.shape == (n_b, C) and out_b.dtype == jnp.float32
    assert jnp.allclose(out_b, ref_b, atol=1e-4, rtol=1e-4), "mismatch vs reference (B)"

    print("KERNEL_OK")
</pallas_src>

<mosaic_0001>
module attributes {stable_mosaic.version = 11 : i64} {
  func.func @_stats_kernel(%arg0: i32, %arg1: memref<190x32xf32, #tpu.memory_space<vmem>>, %arg2: memref<1x190xi32, #tpu.memory_space<vmem>>, %arg3: memref<8x32xf32, #tpu.memory_space<vmem>>, %arg4: memref<8x32xf32, #tpu.memory_space<vmem>>) attributes {dimension_semantics = [#tpu.dimension_semantics<arbitrary>], iteration_bounds = array<i64: 1>, scalar_prefetch = 0 : i64, scratch_operands = 0 : i64, tpu.core_type = #tpu.core_type<tc>, window_params = [{transform_indices = @transform_0, window_bounds = array<i64: 190, 32>}, {transform_indices = @transform_1, window_bounds = array<i64: 1, 190>}, {pipeline_mode = #tpu.pipeline_mode<synchronous>, transform_indices = @transform_2, window_bounds = array<i64: 8, 32>}, {pipeline_mode = #tpu.pipeline_mode<synchronous>, transform_indices = @transform_3, window_bounds = array<i64: 8, 32>}]} {
    %c0_i32 = arith.constant 0 : i32
    %0 = arith.cmpi eq, %arg0, %c0_i32 : i32
    %1 = arith.extui %0 : i1 to i32
    %c0_i32_0 = arith.constant 0 : i32
    %2 = arith.cmpi ne, %1, %c0_i32_0 : i32
    scf.if %2 {
      %cst_15 = arith.constant 0.000000e+00 : f32
      %29 = vector.broadcast %cst_15 : f32 to vector<8x32xf32>
      %c0_16 = arith.constant 0 : index
      %c0_17 = arith.constant 0 : index
      %30 = vector.load %arg3[%c0_16, %c0_17] : memref<8x32xf32, #tpu.memory_space<vmem>>, vector<8x32xf32>
      tpu.vector_store %arg3[%c0_16, %c0_17], %29 {strides = array<i32>} : memref<8x32xf32, #tpu.memory_space<vmem>>, vector<8x32xf32>,
      %cst_18 = arith.constant 0.000000e+00 : f32
      %31 = vector.broadcast %cst_18 : f32 to vector<8x32xf32>
      %c0_19 = arith.constant 0 : index
      %c0_20 = arith.constant 0 : index
      %32 = vector.load %arg4[%c0_19, %c0_20] : memref<8x32xf32, #tpu.memory_space<vmem>>, vector<8x32xf32>
      tpu.vector_store %arg4[%c0_19, %c0_20], %31 {strides = array<i32>} : memref<8x32xf32, #tpu.memory_space<vmem>>, vector<8x32xf32>,
    } else {
    }
    %c0 = arith.constant 0 : index
    %c0_1 = arith.constant 0 : index
    %3 = vector.load %arg1[%c0, %c0_1] : memref<190x32xf32, #tpu.memory_space<vmem>>, vector<190x32xf32>
    %c0_2 = arith.constant 0 : index
    %c0_3 = arith.constant 0 : index
    %4 = vector.load %arg2[%c0_2, %c0_3] : memref<1x190xi32, #tpu.memory_space<vmem>>, vector<1x190xi32>
    %5 = tpu.iota {dimensions = array<i32: 0>} : vector<190x1xi32>
    %c190_i32 = arith.constant 190 : i32
    %6 = arith.muli %arg0, %c190_i32 : i32
    %7 = vector.broadcast %6 : i32 to vector<190x1xi32>
    %8 = arith.addi %5, %7 : vector<190x1xi32>
    %c190_i32_4 = arith.constant 190 : i32
    %9 = vector.broadcast %c190_i32_4 : i32 to vector<190x1xi32>
    %10 = arith.cmpi slt, %8, %9 : vector<190x1xi32>
    %cst = arith.constant 0.000000e+00 : f32
    %11 = vector.shape_cast %10 : vector<190x1xi1> to vector<190x1xi1>
    %12 = vector.broadcast %11 : vector<190x1xi1> to vector<190x32xi1>
    %13 = vector.broadcast %cst : f32 to vector<190x32xf32>
    %14 = arith.select %12, %3, %13 : vector<190x32xi1>, vector<190x32xf32>
    %15 = tpu.iota {dimensions = array<i32: 0>} : vector<8x190xi32>
    %16 = vector.broadcast %4 : vector<1x190xi32> to vector<8x190xi32>
    %17 = arith.cmpi eq, %15, %16 : vector<8x190xi32>
    %18 = arith.extui %17 : vector<8x190xi1> to vector<8x190xi32>
    %19 = arith.sitofp %18 : vector<8x190xi32> to vector<8x190xf32>
    %c0_5 = arith.constant 0 : index
    %c0_6 = arith.constant 0 : index
    %20 = vector.load %arg3[%c0_5, %c0_6] : memref<8x32xf32, #tpu.memory_space<vmem>>, vector<8x32xf32>
    %cst_7 = arith.constant dense<0.000000e+00> : vector<8x32xf32>
    %21 = tpu.matmul %19, %14, %cst_7 {dimension_numbers = #tpu.dot_dimension_numbers<[1], [0], [0], [1], [0, 0, 1, 1], [], []>} : vector<8x190xf32>, vector<190x32xf32>, vector<8x32xf32> -> vector<8x32xf32>
    %22 = arith.addf %20, %21 : vector<8x32xf32>
    %c0_8 = arith.constant 0 : index
    %c0_9 = arith.constant 0 : index
    %23 = vector.load %arg3[%c0_8, %c0_9] : memref<8x32xf32, #tpu.memory_space<vmem>>, vector<8x32xf32>
    tpu.vector_store %arg3[%c0_8, %c0_9], %22 {strides = array<i32>} : memref<8x32xf32, #tpu.memory_space<vmem>>, vector<8x32xf32>,
    %c0_10 = arith.constant 0 : index
    %c0_11 = arith.constant 0 : index
    %24 = vector.load %arg4[%c0_10, %c0_11] : memref<8x32xf32, #tpu.memory_space<vmem>>, vector<8x32xf32>
    %25 = arith.mulf %14, %14 : vector<190x32xf32>
    %cst_12 = arith.constant dense<0.000000e+00> : vector<8x32xf32>
    %26 = tpu.matmul %19, %25, %cst_12 {dimension_numbers = #tpu.dot_dimension_numbers<[1], [0], [0], [1], [0, 0, 1, 1], [], []>} : vector<8x190xf32>, vector<190x32xf32>, vector<8x32xf32> -> vector<8x32xf32>
    %27 = arith.addf %24, %26 : vector<8x32xf32>
    %c0_13 = arith.constant 0 : index
    %c0_14 = arith.constant 0 : index
    %28 = vector.load %arg4[%c0_13, %c0_14] : memref<8x32xf32, #tpu.memory_space<vmem>>, vector<8x32xf32>
    tpu.vector_store %arg4[%c0_13, %c0_14], %27 {strides = array<i32>} : memref<8x32xf32, #tpu.memory_space<vmem>>, vector<8x32xf32>,
    return
  }
  func.func @transform_0(%arg0: i32) -> (i32, i32) {
    %c0_i32 = arith.constant 0 : i32
    %c0_i32_0 = arith.constant 0 : i32
    return %arg0, %c0_i32 : i32, i32
  }
  func.func @transform_1(%arg0: i32) -> (i32, i32) {
    %c0_i32 = arith.constant 0 : i32
    %c0_i32_0 = arith.constant 0 : i32
    return %c0_i32, %arg0 : i32, i32
  }
  func.func @transform_2(%arg0: i32) -> (i32, i32) {
    %c0_i32 = arith.constant 0 : i32
    %c0_i32_0 = arith.constant 0 : i32
    %c0_i32_1 = arith.constant 0 : i32
    return %c0_i32, %c0_i32_0 : i32, i32
  }
  func.func @transform_3(%arg0: i32) -> (i32, i32) {
    %c0_i32 = arith.constant 0 : i32
    %c0_i32_0 = arith.constant 0 : i32
    %c0_i32_1 = arith.constant 0 : i32
    return %c0_i32, %c0_i32_0 : i32, i32
  }
}

</mosaic_0001>

<bundles_post_ra>
// kernel: tpu_custom_call.1
= control target key start
LH: loop header
LB: loop body
LE: loop exit
PB: predicated region body
PF: predicated region fallthrough
CT: control target
= control target key end

     0   :  { %9 = vsyncpa [#allocation3], 0  ;;  %v554_v3 = vmov 0.0|0.0   ;;  %v47_v20 = vlaneseq  ;;  %s718_s0 = inlined_call_operand.vmem [shape: f32[190,32], index: 0, kind: input, shape index: {}]   ;;  %s719_s1 = inlined_call_operand.vmem [shape: s32[1,190], index: 1, kind: input, shape index: {}]   ;;  %s720_s2 = inlined_call_operand.hbm [shape: f32[8,32], index: 2, kind: output, shape index: {0}]   ;;  %s721_s3 = inlined_call_operand.hbm [shape: f32[8,32], index: 3, kind: output, shape index: {1}]  }
   0x1   :  { %v22_v0 = vld [vmem:[%s718_s0] sm:$0xff]  ;;  %v23_v1 = vld [vmem:[%s718_s0 + $0x8] sm:$0xff]  ;;  %v24_v2 = vld [vmem:[%s718_s0 + $0x10] sm:$0xff]  ;;  %426 = vmatprep.subr.bf16.mxu0 %v554_v3  ;;  %463 = vmatprep.subr.bf16.mxu1 %v554_v3 }
   0x2   :  { %v427_v4 = vpack.c.bf16 %v23_v1, %v22_v0  ;;  %v291_v5 = vmul.f32 %v22_v0, %v22_v0  ;;  %v292_v6 = vmul.f32 %v23_v1, %v23_v1  ;;  %v25_v7 = vld [vmem:[%s718_s0 + $0x18] sm:$0xff]  ;;  %v293_v8 = vmul.f32 %v24_v2, %v24_v2  ;;  %v26_v10 = vld [vmem:[%s718_s0 + $0x20] sm:$0xff]  ;;  %v27_v11 = vld [vmem:[%s718_s0 + $0x28] sm:$0xff] }
   0x3   :  { %v294_v9 = vmul.f32 %v25_v7, %v25_v7  ;;  %v430_v13 = vpack.c.bf16 %v25_v7, %v24_v2  ;;  %v295_v15 = vmul.f32 %v26_v10, %v26_v10  ;;  %v296_v16 = vmul.f32 %v27_v11, %v27_v11  ;;  %v28_v17 = vld [vmem:[%s718_s0 + $0x30] sm:$0xff]  ;;  %v29_v18 = vld [vmem:[%s718_s0 + $0x38] sm:$0xff] }
   0x4   :  { %428 = vmatpush1.bf16.msra.mxu0 %v427_v4  ;;  %v464_v12 = vpack.c.bf16 %v292_v6, %v291_v5  ;;  %v433_v19 = vpack.c.bf16 %v27_v11, %v26_v10  ;;  %v297_v22 = vmul.f32 %v28_v17, %v28_v17  ;;  %v298_v23 = vmul.f32 %v29_v18, %v29_v18 }
   0x5   :  { %429 = vmatprep.subr.bf16.mxu0 %v554_v3  ;;  %v467_v14 = vpack.c.bf16 %v294_v9, %v293_v8  ;;  %v470_v21 = vpack.c.bf16 %v296_v16, %v295_v15 }
   0x6   :  { %465 = vmatpush1.bf16.msra.mxu1 %v464_v12 }
   0x7   :  { %466 = vmatprep.subr.bf16.mxu1 %v554_v3 }
   0x8   :  { %431 = vmatpush1.bf16.msra.mxu0 %v430_v13 }
   0x9   :  { %432 = vmatprep.subr.bf16.mxu0 %v554_v3 }
   0xa   :  { %468 = vmatpush1.bf16.msra.mxu1 %v467_v14 }
   0xb   :  { %10 = vsyncpa [#allocation5], 0  ;;  %469 = vmatprep.subr.bf16.mxu1 %v554_v3  ;;  %v30_v24 = vld [vmem:[%s718_s0 + $0x40] sm:$0xff]  ;;  %v31_v25 = vld [vmem:[%s718_s0 + $0x48] sm:$0xff]  ;;  %vm19_vm0 = vcmask 261120   ;;  %v436_v26 = vpack.c.bf16 %v29_v18, %v28_v17  ;;  %v616_v27 = vshrl.u32 %v47_v20, 7  ;;  %v473_v29 = vpack.c.bf16 %v298_v23, %v297_v22 }
   0xc   :  { %434 = vmatpush1.bf16.msra.mxu0 %v433_v19  ;;  %v622_v28 = vld [vmem:[%s719_s1] sm:$0x3]  ;;  %v299_v30 = vmul.f32 %v30_v24, %v30_v24  ;;  %v300_v31 = vmul.f32 %v31_v25, %v31_v25  ;;  %v555_v32 = vmov 0.0   ;;  %v32_v34 = vld [vmem:[%s718_s0 + $0x50] sm:$0xff]  ;;  %v33_v35 = vld [vmem:[%s718_s0 + $0x58] sm:$0xff]  ;;  %v439_v36 = vpack.c.bf16 %v31_v25, %v30_v24  ;;  %s559_s8 = smov [#allocation4]  }
   0xd   :  { %435 = vmatprep.subr.bf16.mxu0 %v554_v3  ;;  %20 = vst.msk [vmem:[#allocation2] sm:$0xff] %vm19_vm0, %v555_v32  ;;  %21 = vst.msk [vmem:[#allocation4] sm:$0xff] %vm19_vm0, %v555_v32  ;;  %v200_v33 = vsub.s32 1, %v616_v27  ;;  %vm209_vm1 = vcmask 506880   ;;  %v301_v39 = vmul.f32 %v32_v34, %v32_v34  ;;  %v302_v40 = vmul.f32 %v33_v35, %v33_v35  ;;  %v34_v41 = vld [vmem:[%s718_s0 + $0x60] sm:$0xff]  ;;  %v35_v42 = vld [vmem:[%s718_s0 + $0x68] sm:$0xff] }
   0xe   :  { %471 = vmatpush1.bf16.msra.mxu1 %v470_v21  ;;  %v476_v38 = vpack.c.bf16 %v300_v31, %v299_v30  ;;  %v442_v44 = vpack.c.bf16 %v33_v35, %v32_v34  ;;  %v303_v46 = vmul.f32 %v34_v41, %v34_v41  ;;  %v304_v47 = vmul.f32 %v35_v42, %v35_v42  ;;  %v36_v48 = vld [vmem:[%s718_s0 + $0x70] sm:$0xff]  ;;  %v37_v49 = vld [vmem:[%s718_s0 + $0x78] sm:$0xff]  ;;  %v38_v54 = vld [vmem:[%s718_s0 + $0x80] sm:$0xff]  ;;  %s406_s9 = sshll.u32 %s559_s8, 4  ;;  %s407_s9 = int_to_ptr.vmem [resolvable:$true] %s406_s9 }
   0xf   :  { %472 = vmatprep.subr.bf16.mxu1 %v554_v3  ;;  %v201_v37 = vrot.slane %v622_v28, %v200_v33  ;;  %v479_v45 = vpack.c.bf16 %v302_v40, %v301_v39  ;;  %v445_v50 = vpack.c.bf16 %v35_v42, %v34_v41  ;;  %v305_v52 = vmul.f32 %v36_v48, %v36_v48  ;;  %v39_v55 = vld [vmem:[%s718_s0 + $0x88] sm:$0xff]  ;;  %v40_v60 = vld [vmem:[%s718_s0 + $0x90] sm:$0xff]  ;;  %v41_v61 = vld [vmem:[%s718_s0 + $0x98] sm:$0xff] }
  0x10   :  { %437 = vmatpush1.bf16.msra.mxu0 %v436_v26  ;;  %v482_v51 = vpack.c.bf16 %v304_v47, %v303_v46  ;;  %v306_v53 = vmul.f32 %v37_v49, %v37_v49  ;;  %v448_v56 = vpack.c.bf16 %v37_v49, %v36_v48  ;;  %v307_v58 = vmul.f32 %v38_v54, %v38_v54  ;;  %v42_v4 = vld [vmem:[%s718_s0 + $0xa0] sm:$0xff]  ;;  %v43_v5 = vld [vmem:[%s718_s0 + $0xa8] sm:$0xff]  ;;  %v45_v7 = vld [vmem:[%s718_s0 + $0xb8] sm:$0x3f] }
  0x11   :  { %438 = vmatprep.subr.bf16.mxu0 %v554_v3  ;;  %vm203_vm2 = vcmp.eq.s32.totalorder %v616_v27, %v201_v37  ;;  %v308_v59 = vmul.f32 %v39_v55, %v39_v55  ;;  %v451_v62 = vpack.c.bf16 %v39_v55, %v38_v54  ;;  %v71_v63 = vadd.s32 184, %v616_v27  ;;  %v44_v11 = vld [vmem:[%s718_s0 + $0xb0] sm:$0xff]  ;;  %s558_s0 = smov [#allocation2]  }
  0x12   :  { %474 = vmatpush1.bf16.msra.mxu1 %v473_v29  ;;  %v419_v43 = vsel %vm203_vm2, 1.0, %v555_v32  ;;  %v485_v57 = vpack.c.bf16 %v306_v53, %v305_v52  ;;  %v309_v1 = vmul.f32 %v40_v60, %v40_v60  ;;  %v310_v2 = vmul.f32 %v41_v61, %v41_v61  ;;  %s396_s7 = sshll.u32 %s558_s0, 4  ;;  %s397_s7 = int_to_ptr.vmem [resolvable:$true] %s396_s7 }
  0x13   :  { %475 = vmatprep.subr.bf16.mxu1 %v554_v3  ;;  %421 = vmatprep.mubr.msk.f32.mxu0 %vm209_vm1, %v419_v43  ;;  %v488_v0 = vpack.c.bf16 %v308_v59, %v307_v58  ;;  %v454_v6 = vpack.c.bf16 %v41_v61, %v40_v60  ;;  %vm121_vm3 = vcmp.lt.s32.totalorder %v71_v63, 190  ;;  %v311_v9 = vmul.f32 %v42_v4, %v42_v4  ;;  %s506_s1 = scalar_lea.vmem %s397_s7, 128  ;;  %p511_p1 = scmp.lt.s32.totalorder %s397_s7, %s397_s7 }
  0x14   :  { %440 = vmatpush1.bf16.msra.mxu0 %v439_v36  ;;  %424 = vmatprep.mubr.msk.f32.mxu1 %vm209_vm1, %v419_v43  ;;  %v491_v8 = vpack.c.bf16 %v310_v2, %v309_v1  ;;  %v312_v10 = vmul.f32 %v43_v5, %v43_v5  ;;  %v193_v12 = vsel %vm121_vm3, %v45_v7, 0.0  ;;  %v457_v13 = vpack.c.bf16 %v43_v5, %v42_v4  ;;  %v208_v22 = vld [vmem:[#allocation2] sm:$0xff]  ;;  %v290_v24 = vld [vmem:[#allocation4] sm:$0xff]  ;;  %p507_p0 = scmp.ne.s32.totalorder %s397_s7, %s506_s1  ;;  %p512_p2 = scmp.lt.s32.totalorder %s506_s1, %s506_s1 }
  0x15   :  { %441 = vmatprep.subr.bf16.mxu0 %v554_v3  ;;  %v196_v14 = vsub.s32 0, %v616_v27  ;;  %vm213_vm4 = vcmask 1045504   ;;  %v313_v16 = vmul.f32 %v44_v11, %v44_v11  ;;  %v314_v17 = vmul.f32 %v193_v12, %v193_v12 }
  0x16   :  { %477 = vmatpush1.bf16.msra.mxu1 %v476_v38  ;;  %v494_v15 = vpack.c.bf16 %v312_v10, %v311_v9  ;;  %v460_v18 = vpack.c.bf16 %v193_v12, %v44_v11  ;;  %vm556_vm5 = vmmov 1   ;;  %v557_v21 = vmov 1.0   ;;  %p513_p3 = por %p512_p2, %p511_p1 }
  0x17   :  { %478 = vmatprep.subr.bf16.mxu1 %v554_v3  ;;  %v197_v19 = vrot.slane %v622_v28, %v196_v14  ;;  %vm461_vm6 = vmpackc.low %vm213_vm4, %vm556_vm5  ;;  %v497_v20 = vpack.c.bf16 %v314_v17, %v313_v16 }
  0x18   :  { %443 = vmatpush1.bf16.msra.mxu0 %v442_v44  ;;  %p514_p4 = pnand %p513_p3, %p507_p0 }
  0x19   :  { %444 = vmatprep.subr.bf16.mxu0 %v554_v3  ;;  %vm202_vm7 = vcmp.eq.s32.totalorder %v616_v27, %v197_v19 }
  0x1a   :  { %480 = vmatpush1.bf16.msra.mxu1 %v479_v45 }
  0x1b   :  { %481 = vmatprep.subr.bf16.mxu1 %v554_v3 }
  0x1c   :  { %446 = vmatpush1.bf16.msra.mxu0 %v445_v50 }
  0x1d   :  { %447 = vmatprep.subr.bf16.mxu0 %v554_v3 }
  0x1e   :  { %483 = vmatpush1.bf16.msra.mxu1 %v482_v51 }
  0x1f   :  { %484 = vmatprep.subr.bf16.mxu1 %v554_v3 }
  0x20   :  { %449 = vmatpush1.bf16.msra.mxu0 %v448_v56 }
  0x21   :  { %450 = vmatprep.subr.bf16.mxu0 %v554_v3 }
  0x22   :  { %486 = vmatpush1.bf16.msra.mxu1 %v485_v57 }
  0x23   :  { %487 = vmatprep.subr.bf16.mxu1 %v554_v3 }
  0x24   :  { %452 = vmatpush1.bf16.msra.mxu0 %v451_v62 }
  0x25   :  { %453 = vmatprep.subr.bf16.mxu0 %v554_v3 }
  0x26   :  { %489 = vmatpush1.bf16.msra.mxu1 %v488_v0 }
  0x27   :  { %490 = vmatprep.subr.bf16.mxu1 %v554_v3 }
  0x28   :  { %455 = vmatpush1.bf16.msra.mxu0 %v454_v6 }
  0x29   :  { %456 = vmatprep.subr.bf16.mxu0 %v554_v3 }
  0x2a   :  { %492 = vmatpush1.bf16.msra.mxu1 %v491_v8 }
  0x2b   :  { %493 = vmatprep.subr.bf16.mxu1 %v554_v3 }
  0x2c   :  { %458 = vmatpush1.bf16.msra.mxu0 %v457_v13 }
  0x2d   :  { %459 = vmatprep.subr.bf16.mxu0 %v554_v3 }
  0x2e   :  { %495 = vmatpush1.bf16.msra.mxu1 %v494_v15 }
  0x2f   :  { %496 = vmatprep.subr.bf16.mxu1 %v554_v3 }
  0x30   :  { %462 = vmatpush1.bf16.msk.msra.mxu0 %vm461_vm6, %v460_v18 }
  0x32   :  { %499 = vmatpush1.bf16.msk.msra.mxu1 %vm461_vm6, %v497_v20 }
  0x33   :  { %422 = vmatmul.mubr.msk.f32.vlgmr.msra.gmra.mrb[0].mxu0 %vm202_vm7, %v557_v21 }
  0x35   :  { %425 = vmatmul.mubr.msk.f32.vlgmr.msra.gmra.mrb[0].mxu1 %vm202_vm7, %v557_v21 }
 0x106   :  { %v283_v23 = vpop.f32.mrb[0].mxu0 }
 0x107   :  { %v287_v25 = vadd.f32 %v283_v23, %v208_v22  ;;  %v285_v26 = vpop.f32.mrb[1].mxu0 }
 0x108   :  { %v384_v28 = vpop.f32.mrb[0].mxu1 }
 0x109   :  { %289 = vst.msk [vmem:[#allocation2] sm:$0xff] %vm19_vm0, %v287_v25  ;;  %v388_v3 = vadd.f32 %v384_v28, %v290_v24  ;;  %v386_v29 = vpop.f32.mrb[1].mxu1 }
 0x10a   :  { %517 = shalt.err (!%p514_p4)
}
 0x10b   :  { %s518_s12 = scalar_lea.hbm %s720_s2, 128 }
 0x10c   :  { %p519_p5 = scmp.ne.s32.totalorder %s720_s2, %s518_s12  ;;  %p522_p6 = scmp.lt.u32.totalorder %s518_s12, %s720_s2 }
 0x10e   :  { %p524_p7 = pnand %p522_p6, %p519_p5 }
 0x110   :  { %527 = shalt.err (!%p524_p7)
}
 0x111   :  { %399 = dma.vmem_to_hbm [thread:$0]  %s397_s7, 128, %s720_s2, [#allocation3]   ;;  %389 = vst.msk [vmem:[#allocation4] sm:$0xff] %vm19_vm0, %v388_v3 }
 0x112   :  { %s528_s19 = scalar_lea.vmem %s407_s9, 128  ;;  %p533_p9 = scmp.lt.s32.totalorder %s407_s9, %s407_s9 }
 0x113   :  { %p529_p8 = scmp.ne.s32.totalorder %s407_s9, %s528_s19  ;;  %p534_p10 = scmp.lt.s32.totalorder %s528_s19, %s528_s19 }
 0x115   :  { %p535_p11 = por %p534_p10, %p533_p9 }
 0x117   :  { %p536_p12 = pnand %p535_p11, %p529_p8 }
 0x119   :  { %539 = shalt.err (!%p536_p12)
}
 0x11a   :  { %s540_s22 = scalar_lea.hbm %s721_s3, 128 }
 0x11b   :  { %p541_p13 = scmp.ne.s32.totalorder %s721_s3, %s540_s22  ;;  %p544_p0 = scmp.lt.u32.totalorder %s540_s22, %s721_s3 }
 0x11d   :  { %p546_p1 = pnand %p544_p0, %p541_p13 }
 0x11f   :  { %549 = shalt.err (!%p546_p1)
}
 0x120   :  { %409 = dma.vmem_to_hbm [thread:$0]  %s407_s9, 128, %s721_s3, [#allocation5]  }
 0x121   :  { %550 = dma.done.wait [#allocation3], 128  }
 0x122   :  { %551 = vsyncadd [#allocation3], 4294967168 }
 0x123   :  { %552 = dma.done.wait [#allocation5], 128  }
 0x124   :  { %553 = vsyncadd [#allocation5], 4294967168 }
 0x125   :  { %416 = vsyncpa [#allocation3], 1 }
 0x126   :  { %417 = vsyncpa [#allocation5], 1 }

</bundles_post_ra>
